<compile_context>
chip_gen: v5e
topology: v5e:2x2
jax: 0.10.0
libtpu: 0.0.40
codegen_flags: <defaults>
</compile_context>

<pallas_src>
import functools

import jax
import jax.numpy as jnp
from jax.experimental import pallas as pl
from jax.experimental.pallas import tpu as pltpu

LANE = 128


def _fused_kernel(x_ref, wct_ref, bc_ref, wh_ref, bh_ref,
                  logits_ref, prob_ref, acc_ref, *, hw, n_pad, f):
    """Grid = (batch, spatial_tiles). Student (m=0) + teacher (m=1) fused."""
    s = pl.program_id(1)

    @pl.when(s == 0)
    def _init():
        acc_ref[...] = jnp.zeros_like(acc_ref)

    x = x_ref[0]                                              # [C, TILE]

    # Backbone: fused 1x1 conv for both models (single MXU op), bias + ReLU,
    # then a per-tile partial sum feeding the global average pool.
    feat = jnp.dot(wct_ref[...], x,
                   preferred_element_type=jnp.float32)        # [2F, TILE] f32
    feat = jnp.maximum(feat + bc_ref[...], 0.0)
    acc_ref[...] += jnp.sum(feat, axis=1, keepdims=True)      # [2F, 1]

    # Head + softmax once per batch element, on the last spatial tile.
    @pl.when(s == pl.num_programs(1) - 1)
    def _finalize():
        acc = acc_ref[...]                                    # [2F, 1]
        if n_pad:
            # Zero-padded spatial columns each contribute exactly ReLU(bias);
            # subtract that once here instead of masking every step.
            acc = acc - jnp.float32(n_pad) * jnp.maximum(bc_ref[...], 0.0)
        pooled = acc * jnp.float32(1.0 / hw)                  # [2F, 1]
        logits_rows, prob_rows = [], []
        for m in range(2):                                    # 0=student, 1=teacher
            pm = pooled[m * f:(m + 1) * f]                    # [F, 1] static slice
            lg = jnp.sum(pm * wh_ref[m], axis=0, keepdims=True) + bh_ref[m]
            mx = jnp.max(lg, axis=-1, keepdims=True)
            e = jnp.exp(lg - mx)
            pr = e / jnp.sum(e, axis=-1, keepdims=True)       # exact normalization
            logits_rows.append(lg)
            prob_rows.append(pr)
        logits_ref[0] = jnp.concatenate(logits_rows, axis=0)  # [2, NC]
        prob_ref[0] = jnp.concatenate(prob_rows, axis=0)      # [2, NC]


def _pick_tile(hw_pad, c, itemsize, two_f, tile_s):
    """Multiple-of-128 tile that divides hw_pad, sized for step/vreg budgets."""
    if tile_s is None:
        byte_target = 1 << 20                                 # ~1 MiB of x / step
        tile_target = max(LANE, byte_target // max(1, c * itemsize))
    else:
        tile_target = tile_s
    # feat [2F, tile] must live in vregs for the elementwise + reduce.
    vreg_cap = max(LANE, (32768 // max(1, two_f)) // LANE * LANE)
    tile_cap = max(LANE, min(tile_target, vreg_cap, hw_pad))
    tile_cap = (tile_cap // LANE) * LANE
    n128 = hw_pad // LANE
    k = tile_cap // LANE
    while n128 % k:
        k -= 1
    return k * LANE


def representation_net_forward(x_nchw, student_params, teacher_params, *,
                               tile_s=None, compute_dtype=None):
    """RepresentationNet.forward: fused student + teacher pass.

    Returns (logits_s, prob_s, logits_t, prob_t); teacher outputs are wrapped
    in stop_gradient (torch.no_grad() equivalent).
    """
    B, C, H, W = x_nchw.shape
    HW = H * W
    wc_s, bc_s, wh_s, bh_s = student_params
    wc_t, bc_t, wh_t, bh_t = teacher_params
    F = wc_s.shape[1]
    NC = wh_s.shape[1]

    dtype = jnp.dtype(x_nchw.dtype if compute_dtype is None else compute_dtype)

    # Conv weights fused to [2F, C] -> one MXU matmul covers both models.
    wct = jnp.concatenate([wc_s.T, wc_t.T], axis=0).astype(dtype)        # [2F, C]
    bcs = jnp.concatenate([bc_s.reshape(F, 1), bc_t.reshape(F, 1)],
                          axis=0).astype(jnp.float32)                    # [2F, 1]
    whs = jnp.stack([wh_s, wh_t], axis=0).astype(jnp.float32)            # [2, F, NC]
    bhs = jnp.stack([bh_s.reshape(1, NC), bh_t.reshape(1, NC)],
                    axis=0).astype(jnp.float32)                          # [2, 1, NC]

    # NCHW -> [B, C, HW] is a free reshape (no transpose pass).
    x = x_nchw.reshape(B, C, HW)
    if x.dtype != dtype:
        # TODO(synk): produce x in the compute dtype upstream (or fuse the
        # cast into the pallas_call input) to avoid this extra HBM pass.
        x = x.astype(dtype)

    # Lane padding only when HW is not a multiple of 128 (pad < 128 columns);
    # the padded contribution is removed exactly at finalize in-kernel.
    hw_pad = pl.cdiv(HW, LANE) * LANE
    n_pad = hw_pad - HW
    if n_pad:
        x = jnp.pad(x, ((0, 0), (0, 0), (0, n_pad)))

    tile = _pick_tile(hw_pad, C, dtype.itemsize, 2 * F, tile_s)
    n_tiles = hw_pad // tile

    kernel = functools.partial(_fused_kernel, hw=HW, n_pad=n_pad, f=F)

    nbytes = (x.size * x.dtype.itemsize
              + wct.size * wct.dtype.itemsize
              + bcs.size * 4 + whs.size * 4 + bhs.size * 4
              + 2 * B * 2 * NC * 4)
    cost = pl.CostEstimate(
        flops=2 * B * HW * C * (2 * F) + 2 * B * 2 * F * NC,
        transcendentals=2 * B * NC,
        bytes_accessed=nbytes)

    logits_pk, prob_pk = pl.pallas_call(
        kernel,
        grid=(B, n_tiles),
        in_specs=[
            pl.BlockSpec((1, C, tile), lambda b, s: (b, 0, s)),    # x tile
            pl.BlockSpec((2 * F, C), lambda b, s: (0, 0)),         # fused conv W^T
            pl.BlockSpec((2 * F, 1), lambda b, s: (0, 0)),         # fused conv bias
            pl.BlockSpec((2, F, NC), lambda b, s: (0, 0, 0)),      # head W
            pl.BlockSpec((2, 1, NC), lambda b, s: (0, 0, 0)),      # head bias
        ],
        out_specs=(
            pl.BlockSpec((1, 2, NC), lambda b, s: (b, 0, 0)),      # logits
            pl.BlockSpec((1, 2, NC), lambda b, s: (b, 0, 0)),      # prob
        ),
        out_shape=(jax.ShapeDtypeStruct((B, 2, NC), jnp.float32),
                   jax.ShapeDtypeStruct((B, 2, NC), jnp.float32)),
        scratch_shapes=[pltpu.VMEM((2 * F, 1), jnp.float32)],
        compiler_params=pltpu.CompilerParams(
            dimension_semantics=("parallel", "arbitrary")),
        cost_estimate=cost,
    )(x, wct, bcs, whs, bhs)

    logits_s, prob_s = logits_pk[:, 0, :], prob_pk[:, 0, :]
    # torch.no_grad() on the teacher -> block gradients through its outputs.
    logits_t = jax.lax.stop_gradient(logits_pk[:, 1, :])
    prob_t = jax.lax.stop_gradient(prob_pk[:, 1, :])
    return logits_s, prob_s, logits_t, prob_t


def init_mean_teacher_params(key, in_ch, hidden, num_classes):
    k1, k2, k3, k4 = jax.random.split(key, 4)
    wc = jax.random.normal(k1, (in_ch, hidden), jnp.float32) * 0.1    # 1x1 conv W
    bc = jax.random.normal(k2, (1, hidden), jnp.float32) * 0.01       # conv bias
    wh = jax.random.normal(k3, (hidden, num_classes), jnp.float32) * 0.1
    bh = jax.random.normal(k4, (1, num_classes), jnp.float32) * 0.01
    return wc, bc, wh, bh


def reference_forward(x_nchw, params):
    """Pure-JAX reference (matches the PyTorch forward semantics)."""
    B, C, H, W = x_nchw.shape
    wc, bc, wh, bh = params
    xf = jnp.transpose(x_nchw, (0, 2, 3, 1)).reshape(B * H * W, C)
    feat = jnp.maximum(xf @ wc + bc, 0.0)
    pooled = jnp.mean(feat.reshape(B, H * W, -1), axis=1)
    logits = pooled @ wh + bh
    prob = jax.nn.softmax(logits, axis=-1)
    return logits, prob


if __name__ == "__main__":
    B, C, H, W = 2, 4, 16, 16
    HIDDEN, NUM_CLASSES = 32, 8

    key = jax.random.PRNGKey(0)
    k_x, k_s, k_t = jax.random.split(key, 3)

    x = jax.random.normal(k_x, (B, C, H, W), jnp.float32)
    student_params = init_mean_teacher_params(k_s, C, HIDDEN, NUM_CLASSES)
    teacher_params = init_mean_teacher_params(k_t, C, HIDDEN, NUM_CLASSES)

    ref_ls, ref_ps = reference_forward(x, student_params)
    ref_lt, ref_pt = reference_forward(x, teacher_params)

    # --- Multi-tile path: tile_s=128 -> 2 spatial grid steps at HW=256 ------
    fwd = jax.jit(functools.partial(representation_net_forward, tile_s=128))
    logits_s, prob_s, logits_t, prob_t = fwd(x, student_params, teacher_params)
    jax.block_until_ready((logits_s, prob_s, logits_t, prob_t))

    assert jnp.allclose(logits_s, ref_ls, atol=1e-4), "student logits mismatch"
    assert jnp.allclose(logits_t, ref_lt, atol=1e-4), "teacher logits mismatch"
    assert jnp.allclose(prob_s, ref_ps, atol=1e-4), "student prob mismatch"
    assert jnp.allclose(prob_t, ref_pt, atol=1e-4), "teacher prob mismatch"
    assert jnp.allclose(jnp.sum(prob_s, axis=-1), 1.0, atol=1e-4)
    assert jnp.allclose(jnp.sum(prob_t, axis=-1), 1.0, atol=1e-4)

    # --- Default auto-tiled path (single spatial step at these shapes) ------
    out_auto = jax.jit(representation_net_forward)(x, student_params,
                                                   teacher_params)
    jax.block_until_ready(out_auto)
    assert jnp.allclose(out_auto[0], ref_ls, atol=1e-4)
    assert jnp.allclose(out_auto[3], ref_pt, atol=1e-4)

    # --- Non-lane-aligned spatial extent: exercises pad + finalize fix ------
    x_odd = jax.random.normal(k_x, (B, C, 10, 10), jnp.float32)   # HW=100
    out_odd = jax.jit(representation_net_forward)(x_odd, student_params,
                                                  teacher_params)
    jax.block_until_ready(out_odd)
    ref_odd_ls, ref_odd_ps = reference_forward(x_odd, student_params)
    assert jnp.allclose(out_odd[0], ref_odd_ls, atol=1e-4), "padded logits mismatch"
    assert jnp.allclose(out_odd[1], ref_odd_ps, atol=1e-4), "padded prob mismatch"

    # --- bf16 streaming path (f32 accumulation / softmax retained) ----------
    bf_out = representation_net_forward(x.astype(jnp.bfloat16),
                                        student_params, teacher_params)
    jax.block_until_ready(bf_out)
    assert jnp.allclose(bf_out[0], ref_ls, atol=5e-2), "bf16 logits mismatch"
    assert jnp.allclose(jnp.sum(bf_out[1], axis=-1), 1.0, atol=1e-3)

    print("KERNEL_OK")
</pallas_src>

<mosaic_0001>
module attributes {stable_mosaic.version = 11 : i64} {
  func.func @_fused_kernel(%arg0: i32, %arg1: i32, %arg2: memref<1x4x128xf32, #tpu.memory_space<vmem>>, %arg3: memref<64x4xf32, #tpu.memory_space<vmem>>, %arg4: memref<64x1xf32, #tpu.memory_space<vmem>>, %arg5: memref<2x32x8xf32, #tpu.memory_space<vmem>>, %arg6: memref<2x1x8xf32, #tpu.memory_space<vmem>>, %arg7: memref<1x2x8xf32, #tpu.memory_space<vmem>>, %arg8: memref<1x2x8xf32, #tpu.memory_space<vmem>>, %arg9: memref<64x1xf32, #tpu.memory_space<vmem>>) attributes {dimension_semantics = [#tpu.dimension_semantics<parallel>, #tpu.dimension_semantics<arbitrary>], iteration_bounds = array<i64: 2, 2>, scalar_prefetch = 0 : i64, scratch_operands = 1 : i64, tpu.core_type = #tpu.core_type<tc>, window_params = [{transform_indices = @transform_0, window_bounds = array<i64: 1, 4, 128>}, {pipeline_mode = #tpu.pipeline_mode<synchronous>, transform_indices = @transform_1, window_bounds = array<i64: 64, 4>}, {pipeline_mode = #tpu.pipeline_mode<synchronous>, transform_indices = @transform_2, window_bounds = array<i64: 64, 1>}, {pipeline_mode = #tpu.pipeline_mode<synchronous>, transform_indices = @transform_3, window_bounds = array<i64: 2, 32, 8>}, {pipeline_mode = #tpu.pipeline_mode<synchronous>, transform_indices = @transform_4, window_bounds = array<i64: 2, 1, 8>}, {transform_indices = @transform_5, window_bounds = array<i64: 1, 2, 8>}, {transform_indices = @transform_6, window_bounds = array<i64: 1, 2, 8>}]} {
    %c0_i32 = arith.constant 0 : i32
    %0 = arith.cmpi eq, %arg1, %c0_i32 : i32
    %1 = arith.extui %0 : i1 to i32
    %c0_i32_0 = arith.constant 0 : i32
    %2 = arith.cmpi ne, %1, %c0_i32_0 : i32
    scf.if %2 {
      %cst_14 = arith.constant 0.000000e+00 : f32
      %20 = vector.broadcast %cst_14 : f32 to vector<64x1xf32>
      %c0_15 = arith.constant 0 : index
      %c0_16 = arith.constant 0 : index
      %21 = vector.load %arg9[%c0_15, %c0_16] : memref<64x1xf32, #tpu.memory_space<vmem>>, vector<64x1xf32>
      tpu.vector_store %arg9[%c0_15, %c0_16], %20 {strides = array<i32>} : memref<64x1xf32, #tpu.memory_space<vmem>>, vector<64x1xf32>,
    } else {
    }
    %c0 = arith.constant 0 : index
    %c0_1 = arith.constant 0 : index
    %c0_2 = arith.constant 0 : index
    %3 = vector.load %arg2[%c0, %c0_1, %c0_2] : memref<1x4x128xf32, #tpu.memory_space<vmem>>, vector<1x4x128xf32>
    %4 = vector.shape_cast %3 : vector<1x4x128xf32> to vector<4x128xf32>
    %c0_3 = arith.constant 0 : index
    %c0_4 = arith.constant 0 : index
    %5 = vector.load %arg3[%c0_3, %c0_4] : memref<64x4xf32, #tpu.memory_space<vmem>>, vector<64x4xf32>
    %cst = arith.constant dense<0.000000e+00> : vector<64x128xf32>
    %6 = tpu.matmul %5, %4, %cst {dimension_numbers = #tpu.dot_dimension_numbers<[1], [0], [0], [1], [0, 0, 1, 1], [], []>} : vector<64x4xf32>, vector<4x128xf32>, vector<64x128xf32> -> vector<64x128xf32>
    %c0_5 = arith.constant 0 : index
    %c0_6 = arith.constant 0 : index
    %7 = vector.load %arg4[%c0_5, %c0_6] : memref<64x1xf32, #tpu.memory_space<vmem>>, vector<64x1xf32>
    %8 = vector.broadcast %7 : vector<64x1xf32> to vector<64x128xf32>
    %9 = arith.addf %6, %8 : vector<64x128xf32>
    %cst_7 = arith.constant 0.000000e+00 : f32
    %10 = vector.broadcast %cst_7 : f32 to vector<64x128xf32>
    %11 = arith.maximumf %9, %10 : vector<64x128xf32>
    %c0_8 = arith.constant 0 : index
    %c0_9 = arith.constant 0 : index
    %12 = vector.load %arg9[%c0_8, %c0_9] : memref<64x1xf32, #tpu.memory_space<vmem>>, vector<64x1xf32>
    %cst_10 = arith.constant dense<0.000000e+00> : vector<64xf32>
    %13 = vector.multi_reduction <add>, %11, %cst_10 [1] : vector<64x128xf32> to vector<64xf32>
    %14 = vector.shape_cast %13 : vector<64xf32> to vector<64x1xf32>
    %15 = arith.addf %12, %14 : vector<64x1xf32>
    %c0_11 = arith.constant 0 : index
    %c0_12 = arith.constant 0 : index
    %16 = vector.load %arg9[%c0_11, %c0_12] : memref<64x1xf32, #tpu.memory_space<vmem>>, vector<64x1xf32>
    tpu.vector_store %arg9[%c0_11, %c0_12], %15 {strides = array<i32>} : memref<64x1xf32, #tpu.memory_space<vmem>>, vector<64x1xf32>,
    %c1_i32 = arith.constant 1 : i32
    %17 = arith.cmpi eq, %arg1, %c1_i32 : i32
    %18 = arith.extui %17 : i1 to i32
    %c0_i32_13 = arith.constant 0 : i32
    %19 = arith.cmpi ne, %18, %c0_i32_13 : i32
    scf.if %19 {
      %c0_14 = arith.constant 0 : index
      %c0_15 = arith.constant 0 : index
      %20 = vector.load %arg9[%c0_14, %c0_15] : memref<64x1xf32, #tpu.memory_space<vmem>>, vector<64x1xf32>
      %cst_16 = arith.constant 3.906250e-03 : f32
      %21 = vector.broadcast %cst_16 : f32 to vector<64x1xf32>
      %22 = arith.mulf %20, %21 : vector<64x1xf32>
      %23 = vector.extract_strided_slice %22 {offsets = [0, 0], sizes = [32, 1], strides = [1, 1]} : vector<64x1xf32> to vector<32x1xf32>
      %c0_17 = arith.constant 0 : index
      %c0_18 = arith.constant 0 : index
      %c0_19 = arith.constant 0 : index
      %24 = vector.load %arg5[%c0_17, %c0_18, %c0_19] : memref<2x32x8xf32, #tpu.memory_space<vmem>>, vector<1x32x8xf32>
      %25 = vector.shape_cast %24 : vector<1x32x8xf32> to vector<32x8xf32>
      %26 = vector.broadcast %23 : vector<32x1xf32> to vector<32x8xf32>
      %27 = arith.mulf %26, %25 : vector<32x8xf32>
      %cst_20 = arith.constant dense<0.000000e+00> : vector<8xf32>
      %28 = vector.multi_reduction <add>, %27, %cst_20 [0] : vector<32x8xf32> to vector<8xf32>
      %29 = vector.shape_cast %28 : vector<8xf32> to vector<1x8xf32>
      %c0_21 = arith.constant 0 : index
      %c0_22 = arith.constant 0 : index
      %c0_23 = arith.constant 0 : index
      %30 = vector.load %arg6[%c0_21, %c0_22, %c0_23] : memref<2x1x8xf32, #tpu.memory_space<vmem>>, vector<1x1x8xf32>
      %31 = vector.shape_cast %30 : vector<1x1x8xf32> to vector<1x8xf32>
      %32 = arith.addf %29, %31 : vector<1x8xf32>
      %cst_24 = arith.constant dense<0xFF800000> : vector<1xf32>
      %33 = vector.multi_reduction <maximumf>, %32, %cst_24 [1] : vector<1x8xf32> to vector<1xf32>
      %34 = vector.shape_cast %33 : vector<1xf32> to vector<1x1xf32>
      %35 = vector.broadcast %34 : vector<1x1xf32> to vector<1x8xf32>
      %36 = arith.subf %32, %35 : vector<1x8xf32>
      %37 = math.exp %36 : vector<1x8xf32>
      %cst_25 = arith.constant dense<0.000000e+00> : vector<1xf32>
      %38 = vector.multi_reduction <add>, %37, %cst_25 [1] : vector<1x8xf32> to vector<1xf32>
      %39 = vector.shape_cast %38 : vector<1xf32> to vector<1x1xf32>
      %40 = vector.broadcast %39 : vector<1x1xf32> to vector<1x8xf32>
      %41 = arith.divf %37, %40 : vector<1x8xf32>
      %42 = vector.extract_strided_slice %22 {offsets = [32, 0], sizes = [32, 1], strides = [1, 1]} : vector<64x1xf32> to vector<32x1xf32>
      %c1 = arith.constant 1 : index
      %c0_26 = arith.constant 0 : index
      %c0_27 = arith.constant 0 : index
      %43 = vector.load %arg5[%c1, %c0_26, %c0_27] : memref<2x32x8xf32, #tpu.memory_space<vmem>>, vector<1x32x8xf32>
      %44 = vector.shape_cast %43 : vector<1x32x8xf32> to vector<32x8xf32>
      %45 = vector.broadcast %42 : vector<32x1xf32> to vector<32x8xf32>
      %46 = arith.mulf %45, %44 : vector<32x8xf32>
      %cst_28 = arith.constant dense<0.000000e+00> : vector<8xf32>
      %47 = vector.multi_reduction <add>, %46, %cst_28 [0] : vector<32x8xf32> to vector<8xf32>
      %48 = vector.shape_cast %47 : vector<8xf32> to vector<1x8xf32>
      %c1_29 = arith.constant 1 : index
      %c0_30 = arith.constant 0 : index
      %c0_31 = arith.constant 0 : index
      %49 = vector.load %arg6[%c1_29, %c0_30, %c0_31] : memref<2x1x8xf32, #tpu.memory_space<vmem>>, vector<1x1x8xf32>
      %50 = vector.shape_cast %49 : vector<1x1x8xf32> to vector<1x8xf32>
      %51 = arith.addf %48, %50 : vector<1x8xf32>
      %cst_32 = arith.constant dense<0xFF800000> : vector<1xf32>
      %52 = vector.multi_reduction <maximumf>, %51, %cst_32 [1] : vector<1x8xf32> to vector<1xf32>
      %53 = vector.shape_cast %52 : vector<1xf32> to vector<1x1xf32>
      %54 = vector.broadcast %53 : vector<1x1xf32> to vector<1x8xf32>
      %55 = arith.subf %51, %54 : vector<1x8xf32>
      %56 = math.exp %55 : vector<1x8xf32>
      %cst_33 = arith.constant dense<0.000000e+00> : vector<1xf32>
      %57 = vector.multi_reduction <add>, %56, %cst_33 [1] : vector<1x8xf32> to vector<1xf32>
      %58 = vector.shape_cast %57 : vector<1xf32> to vector<1x1xf32>
      %59 = vector.broadcast %58 : vector<1x1xf32> to vector<1x8xf32>
      %60 = arith.divf %56, %59 : vector<1x8xf32>
      %61 = tpu.concatenate %32, %51 in 0 : vector<1x8xf32>, vector<1x8xf32> -> vector<2x8xf32>
      %c0_34 = arith.constant 0 : index
      %c0_35 = arith.constant 0 : index
      %c0_36 = arith.constant 0 : index
      %62 = vector.load %arg7[%c0_34, %c0_35, %c0_36] : memref<1x2x8xf32, #tpu.memory_space<vmem>>, vector<1x2x8xf32>
      %63 = vector.shape_cast %62 : vector<1x2x8xf32> to vector<2x8xf32>
      %64 = vector.shape_cast %61 : vector<2x8xf32> to vector<1x2x8xf32>
      tpu.vector_store %arg7[%c0_34, %c0_35, %c0_36], %64 {strides = array<i32>} : memref<1x2x8xf32, #tpu.memory_space<vmem>>, vector<1x2x8xf32>,
      %65 = tpu.concatenate %41, %60 in 0 : vector<1x8xf32>, vector<1x8xf32> -> vector<2x8xf32>
      %c0_37 = arith.constant 0 : index
      %c0_38 = arith.constant 0 : index
      %c0_39 = arith.constant 0 : index
      %66 = vector.load %arg8[%c0_37, %c0_38, %c0_39] : memref<1x2x8xf32, #tpu.memory_space<vmem>>, vector<1x2x8xf32>
      %67 = vector.shape_cast %66 : vector<1x2x8xf32> to vector<2x8xf32>
      %68 = vector.shape_cast %65 : vector<2x8xf32> to vector<1x2x8xf32>
      tpu.vector_store %arg8[%c0_37, %c0_38, %c0_39], %68 {strides = array<i32>} : memref<1x2x8xf32, #tpu.memory_space<vmem>>, vector<1x2x8xf32>,
    } else {
    }
    return
  }
  func.func @transform_0(%arg0: i32, %arg1: i32) -> (i32, i32, i32) {
    %c0_i32 = arith.constant 0 : i32
    %c0_i32_0 = arith.constant 0 : i32
    return %arg0, %c0_i32, %arg1 : i32, i32, i32
  }
  func.func @transform_1(%arg0: i32, %arg1: i32) -> (i32, i32) {
    %c0_i32 = arith.constant 0 : i32
    %c0_i32_0 = arith.constant 0 : i32
    %c0_i32_1 = arith.constant 0 : i32
    return %c0_i32, %c0_i32_0 : i32, i32
  }
  func.func @transform_2(%arg0: i32, %arg1: i32) -> (i32, i32) {
    %c0_i32 = arith.constant 0 : i32
    %c0_i32_0 = arith.constant 0 : i32
    %c0_i32_1 = arith.constant 0 : i32
    return %c0_i32, %c0_i32_0 : i32, i32
  }
  func.func @transform_3(%arg0: i32, %arg1: i32) -> (i32, i32, i32) {
    %c0_i32 = arith.constant 0 : i32
    %c0_i32_0 = arith.constant 0 : i32
    %c0_i32_1 = arith.constant 0 : i32
    %c0_i32_2 = arith.constant 0 : i32
    return %c0_i32, %c0_i32_0, %c0_i32_1 : i32, i32, i32
  }
  func.func @transform_4(%arg0: i32, %arg1: i32) -> (i32, i32, i32) {
    %c0_i32 = arith.constant 0 : i32
    %c0_i32_0 = arith.constant 0 : i32
    %c0_i32_1 = arith.constant 0 : i32
    %c0_i32_2 = arith.constant 0 : i32
    return %c0_i32, %c0_i32_0, %c0_i32_1 : i32, i32, i32
  }
  func.func @transform_5(%arg0: i32, %arg1: i32) -> (i32, i32, i32) {
    %c0_i32 = arith.constant 0 : i32
    %c0_i32_0 = arith.constant 0 : i32
    %c0_i32_1 = arith.constant 0 : i32
    return %arg0, %c0_i32, %c0_i32_0 : i32, i32, i32
  }
  func.func @transform_6(%arg0: i32, %arg1: i32) -> (i32, i32, i32) {
    %c0_i32 = arith.constant 0 : i32
    %c0_i32_0 = arith.constant 0 : i32
    %c0_i32_1 = arith.constant 0 : i32
    return %arg0, %c0_i32, %c0_i32_0 : i32, i32, i32
  }
}

</mosaic_0001>

<bundles_post_ra>
// kernel: representation_net_forward.1
= control target key start
LH: loop header
LB: loop body
LE: loop exit
PB: predicated region body
PF: predicated region fallthrough
CT: control target
= control target key end

     0   :  { %s909_s21 = smov 0   ;;  %s911_s22 = smov 0   ;;  %s1094_s0 = inlined_call_operand.vmem [shape: f32[2,4,256], index: 0, kind: input, shape index: {}]   ;;  %s1095_s1 = inlined_call_operand.vmem [shape: f32[64,4], index: 1, kind: input, shape index: {}]   ;;  %s1096_s2 = inlined_call_operand.vmem [shape: f32[64,1], index: 2, kind: input, shape index: {}]   ;;  %s1097_s3 = inlined_call_operand.vmem [shape: f32[2,32,8], index: 3, kind: input, shape index: {}]   ;;  %s1098_s4 = inlined_call_operand.vmem [shape: f32[2,1,8], index: 4, kind: input, shape index: {}]   ;;  %s1099_s5 = inlined_call_operand.vmem [shape: f32[2,2,8], index: 5, kind: output, shape index: {0}]   ;;  %s1100_s6 = inlined_call_operand.vmem [shape: f32[2,2,8], index: 6, kind: output, shape index: {1}]  }
   0x1   :  { %s913_s23 = smov 0   ;;  %s915_s24 = smov 0  }
   0x2   :  { %s917_s25 = smov 0  }
   0x3 LB: > { %s26_s26 = sadd.s32 1, %s861_s23  ;;  %s29_s27 = sadd.s32 1, %s865_s24  ;;  %s869_s25 = sphi %s917_s25, %s17_s25   ;;  %s865_s24 = sphi %s915_s24, %s1104_s24   ;;  %s861_s23 = sphi %s913_s23, %s1103_s23   ;;  %s857_s22 = sphi %s911_s22, %s1102_s22   ;;  %s853_s21 = sphi %s909_s21, %s1101_s21  }
   0x4   : > { %p27_p0 = scmp.ge.s32.totalorder %s26_s26, 2  ;;  %p748_p1 = scmp.ge.s32.totalorder %s869_s25, 1 }
   0x5   : > { %p232_p2 = scmp.lt.s32.totalorder %s869_s25, 5 }
   0x6   : > { %s1106_s26 = smov (%p27_p0, %s26_s26), 0  ;;  %s1108_s27 = smov (!%p27_p0, %s29_s27), %s865_s24 }
   0x7   : > { %p233_p3 = pnand %p748_p1, %p232_p2  ;;  %p31_p4 = scmp.ge.s32.totalorder %s1108_s27, 2 }
   0x8   : > { %p268_p5 = scmp.lt.s32.totalorder (!%p233_p3), %s857_s22, 1  ;;  %p270_p6 = scmp.lt.s32.totalorder (!%p233_p3), %s853_s21, 1 }
   0x9   : > { %s1110_s27 = smov (%p31_p4, %s1108_s27), 0  ;;  %236 = sbr.rel (%p233_p3) target bundleno = 728 (0x2d8), region = 40 }
   0xa   : > { %p753_p7 = scmp.ne.s32.totalorder (!%p233_p3), %s853_s21, 0 }
   0xe   : > { %s1112_s22 = smov (!%p268_p5, %s857_s22), 1 }
   0xf   : > { %s271_s28 = scalar_select %p270_p6, %s853_s21, 1 }
  0x10   : > { %s943_s29 = sshll.u32 %s1112_s22, 1  ;;  %287 = sbr.rel (%p753_p7) target bundleno = 30 (0x1e), region = 44 }
  0x11   : > { %s273_s30 = sadd.s32 %s943_s29, %s271_s28  ;;  %s279_s9 = scalar_lea.vmem %s1099_s5, %s943_s29 }
  0x12   : > { %s750_s10 = sshll.u32 %s273_s30, 2  ;;  %s283_s13 = scalar_lea.vmem %s1100_s6, %s943_s29 }
  0x13   : > { %s275_s16 = scalar_lea.vmem %s1094_s0, %s750_s10 }
  0x15   : > { %vm288_vm0 = vcmask 7168   ;;  %v871_v0 = vmov 0.0  }
  0x16   : > { %289 = vst.msk [vmem:[#allocation2] sm:$0xff] %vm288_vm0, %v871_v0 }
  0x17   : > { %290 = vst.msk [vmem:[#allocation2 + $0x8] sm:$0xff] %vm288_vm0, %v871_v0 }
  0x18   : > { %291 = vst.msk [vmem:[#allocation2 + $0x10] sm:$0xff] %vm288_vm0, %v871_v0 }
  0x19   : > { %292 = vst.msk [vmem:[#allocation2 + $0x18] sm:$0xff] %vm288_vm0, %v871_v0 }
  0x1a   : > { %293 = vst.msk [vmem:[#allocation2 + $0x20] sm:$0xff] %vm288_vm0, %v871_v0 }
  0x1b   : > { %294 = vst.msk [vmem:[#allocation2 + $0x28] sm:$0xff] %vm288_vm0, %v871_v0 }
  0x1c   : > { %295 = vst.msk [vmem:[#allocation2 + $0x30] sm:$0xff] %vm288_vm0, %v871_v0 }
  0x1d   : > { %296 = vst.msk [vmem:[#allocation2 + $0x38] sm:$0xff] %vm288_vm0, %v871_v0 }
  0x1e PF: > { %v297_v1 = vld [vmem:[%s275_s16] sm:$0xf]  ;;  %vm379_vm1 = vcmask 1043456   ;;  %v872_v3 = vmov 0   ;;  %vm354_vm2 = vcmask 31744   ;;  %v300_v5 = vld [vmem:[%s1095_s1 + $0x10] sm:$0xff] }
  0x1f   : > { %v306_v2 = vld [vmem:[%s1096_s2] sm:$0xff]  ;;  %817 = vset.pattern.permute.xlu0 %v872_v3  ;;  %754 = vmatpush.msk.msra.mxu0 %vm379_vm1, %v297_v1  ;;  %v304_v7 = vld [vmem:[%s1095_s1 + $0x30] sm:$0xff]  ;;  %v307_v10 = vld [vmem:[%s1096_s2 + $0x8] sm:$0xff]  ;;  %vm464_vm3 = vcmask 7168   ;;  %p763_p8 = scmp.ne.s32.totalorder %s853_s21, 1 }
  0x20   : > { %v298_v4 = vld [vmem:[%s1095_s1] sm:$0xff]  ;;  %771 = vmatpush.msk.msra.mxu1 %vm379_vm1, %v297_v1  ;;  %772 = vmatpush.msk.msra.mxu2 %vm379_vm1, %v297_v1  ;;  %v308_v8 = vld [vmem:[%s1096_s2 + $0x10] sm:$0xff]  ;;  %v299_v11 = vld [vmem:[%s1095_s1 + $0x8] sm:$0xff] }
  0x21   : > { %v302_v6 = vld [vmem:[%s1095_s1 + $0x20] sm:$0xff]  ;;  %773 = vmatpush.msk.msra.mxu3 %vm379_vm1, %v297_v1  ;;  %316 = vperm.xlu0 %817, %v306_v2   ;;  %v301_v12 = vld [vmem:[%s1095_s1 + $0x18] sm:$0xff]  ;;  %v303_v13 = vld [vmem:[%s1095_s1 + $0x28] sm:$0xff] }
  0x22   : > { %755 = vmatmul.msk.f32.vlgmr.msra.gmra.mxu0 %vm354_vm2, %v298_v4  ;;  %757 = vmatmul.msk.f32.vlgmr.msra.gmra.mxu1 %vm354_vm2, %v300_v5  ;;  %v310_v9 = vld [vmem:[%s1096_s2 + $0x20] sm:$0xff]  ;;  %v305_v14 = vld [vmem:[%s1095_s1 + $0x38] sm:$0xff]  ;;  %v311_v16 = vld [vmem:[%s1096_s2 + $0x28] sm:$0xff] }
  0x23   : > { %759 = vmatmul.msk.f32.vlgmr.msra.gmra.mxu2 %vm354_vm2, %v302_v6  ;;  %761 = vmatmul.msk.f32.vlgmr.msra.gmra.mxu3 %vm354_vm2, %v304_v7  ;;  %v309_v15 = vld [vmem:[%s1096_s2 + $0x18] sm:$0xff]  ;;  %v312_v17 = vld [vmem:[%s1096_s2 + $0x30] sm:$0xff]  ;;  %v432_v51 = vld [vmem:[#allocation2] sm:$0xff] }
  0x24   : > { %818 = vset.pattern.permute.xlu1 %v872_v3  ;;  %819 = vset.pattern.permute.xlu2 %v872_v3  ;;  %v313_v18 = vld [vmem:[%s1096_s2 + $0x38] sm:$0xff]  ;;  %v434_v52 = vld [vmem:[#allocation2 + $0x10] sm:$0xff]  ;;  %v433_v57 = vld [vmem:[#allocation2 + $0x8] sm:$0xff] }
  0x25   : > { %326 = vperm.xlu1 %818, %v308_v8   ;;  %336 = vperm.xlu2 %819, %v310_v9   ;;  %v436_v58 = vld [vmem:[#allocation2 + $0x20] sm:$0xff]  ;;  %v438_v59 = vld [vmem:[#allocation2 + $0x30] sm:$0xff]  ;;  %v437_v2 = vld [vmem:[#allocation2 + $0x28] sm:$0xff] }
  0x26   : > { %v435_v3 = vld [vmem:[#allocation2 + $0x18] sm:$0xff] }
  0x27   : > { %v439_v8 = vld [vmem:[#allocation2 + $0x38] sm:$0xff] }
  0x29   : > { %321 = vperm.xlu0 %817, %v307_v10  }
  0x2a   : > { %756 = vmatmul.msk.f32.gmra.mxu0 %vm354_vm2, %v299_v11  ;;  %758 = vmatmul.msk.f32.gmra.mxu1 %vm354_vm2, %v301_v12 }
  0x2b   : > { %760 = vmatmul.msk.f32.gmra.mxu2 %vm354_vm2, %v303_v13  ;;  %762 = vmatmul.msk.f32.gmra.mxu3 %vm354_vm2, %v305_v14 }
  0x2d   : > { %331 = vperm.xlu1 %818, %v309_v15   ;;  %341 = vperm.xlu2 %819, %v311_v16  }
  0x31   : > { %346 = vperm.xlu0 %817, %v312_v17  }
  0x35   : > { %351 = vperm.xlu1 %818, %v313_v18  }
  0x7f   : > { %v337_v28 = vpop.permute.xlu2 %336 }
  0x87   : > { %v342_v41 = vpop.permute.xlu2 %341 }
  0x93   : > { %v317_v19 = vpop.permute.xlu0 %316 }
  0x97   : > { %v327_v22 = vpop.permute.xlu1 %326 }
  0x9b   : > { %v322_v20 = vpop.permute.xlu0 %321 }
  0x9f   : > { %v400_v21 = vpop.f32.mrf.mxu0  ;;  %v406_v24 = vpop.f32.mrf.mxu1 }
  0xa0   : > { %v401_v23 = vadd.f32 %v400_v21, %v317_v19  ;;  %v407_v25 = vadd.f32 %v406_v24, %v327_v22  ;;  %v332_v38 = vpop.permute.xlu1 %331 }
  0xa2   : > { %v424_v26 = vmax.f32 %v401_v23, 0.0  ;;  %v426_v27 = vmax.f32 %v407_v25, 0.0 }
  0xa3   : > { %v347_v29 = vpop.permute.xlu0 %346 }
  0xa4   : > { %440 = vadd.xlane.f32.xlu2 %v424_v26  ;;  %444 = vadd.xlane.f32.xlu1 %v426_v27 }
  0xa6   : > { %v412_v30 = vpop.f32.mrf.mxu2  ;;  %v418_v31 = vpop.f32.mrf.mxu3 }
  0xa7   : > { %v413_v32 = vadd.f32 %v412_v30, %v337_v28  ;;  %v419_v33 = vadd.f32 %v418_v31, %v347_v29  ;;  %v403_v34 = vpop.f32.mrf.mxu0  ;;  %v409_v40 = vpop.f32.mrf.mxu1 }
  0xa8   : > { %v404_v35 = vadd.f32 %v403_v34, %v322_v20  ;;  %v410_v42 = vadd.f32 %v409_v40, %v332_v38  ;;  %v352_v48 = vpop.permute.xlu1 %351 }
  0xa9   : > { %v428_v36 = vmax.f32 %v413_v32, 0.0  ;;  %v430_v39 = vmax.f32 %v419_v33, 0.0 }
  0xaa   : > { %v425_v37 = vmax.f32 %v404_v35, 0.0  ;;  %v427_v45 = vmax.f32 %v410_v42, 0.0 }
  0xac   : > { %442 = vadd.xlane.f32.xlu0 %v425_v37  ;;  %448 = vadd.xlane.f32.xlu2 %v428_v36 }
  0xad   : > { %452 = vadd.xlane.f32.xlu1 %v430_v39 }
  0xae   : > { %v415_v43 = vpop.f32.mrf.mxu2  ;;  %v421_v47 = vpop.f32.mrf.mxu3 }
  0xaf   : > { %v416_v44 = vadd.f32 %v415_v43, %v342_v41  ;;  %v422_v49 = vadd.f32 %v421_v47, %v352_v48 }
  0xb1   : > { %v429_v46 = vmax.f32 %v416_v44, 0.0  ;;  %v431_v50 = vmax.f32 %v422_v49, 0.0 }
  0xb4   : > { %450 = vadd.xlane.f32.xlu0 %v429_v46  ;;  %446 = vadd.xlane.f32.xlu2 %v427_v45 }
  0xbc   : > { %454 = vadd.xlane.f32.xlu2 %v431_v50 }
 0x117   : > { %v441_v53 = vpop.xlane.xlu2 %440  ;;  %v445_v54 = vpop.xlane.xlu1 %444 }
 0x118   : > { %v456_v55 = vadd.f32 %v441_v53, %v432_v51  ;;  %v458_v56 = vadd.f32 %v445_v54, %v434_v52 }
 0x11a   : > { %465 = vst.msk [vmem:[#allocation2] sm:$0xff] %vm464_vm3, %v456_v55 }
 0x11b   : > { %467 = vst.msk [vmem:[#allocation2 + $0x10] sm:$0xff] %vm464_vm3, %v458_v56 }
 0x11f   : > { %v443_v60 = vpop.xlane.xlu0 %442  ;;  %v449_v61 = vpop.xlane.xlu2 %448 }
 0x120   : > { %v453_v62 = vpop.xlane.xlu1 %452  ;;  %v457_v63 = vadd.f32 %v443_v60, %v433_v57  ;;  %v460_v0 = vadd.f32 %v449_v61, %v436_v58 }
 0x121   : > { %v462_v1 = vadd.f32 %v453_v62, %v438_v59 }
 0x122   : > { %466 = vst.msk [vmem:[#allocation2 + $0x8] sm:$0xff] %vm464_vm3, %v457_v63 }
 0x123   : > { %471 = vst.msk [vmem:[#allocation2 + $0x30] sm:$0xff] %vm464_vm3, %v462_v1 }
 0x124   : > { %469 = vst.msk [vmem:[#allocation2 + $0x20] sm:$0xff] %vm464_vm3, %v460_v0 }
 0x127   : > { %v451_v4 = vpop.xlane.xlu0 %450  ;;  %v447_v5 = vpop.xlane.xlu2 %446 }
 0x128   : > { %v461_v6 = vadd.f32 %v451_v4, %v437_v2  ;;  %v459_v7 = vadd.f32 %v447_v5, %v435_v3 }
 0x12a   : > { %470 = vst.msk [vmem:[#allocation2 + $0x28] sm:$0xff] %vm464_vm3, %v461_v6 }
 0x12b   : > { %468 = vst.msk [vmem:[#allocation2 + $0x18] sm:$0xff] %vm464_vm3, %v459_v7 }
 0x12e   : > { %476 = sbr.rel (%p763_p8) target bundleno = 728 (0x2d8), region = 48 }
 0x12f   : > { %v455_v9 = vpop.xlane.xlu2 %454 }
 0x130   : > { %v463_v10 = vadd.f32 %v455_v9, %v439_v8 }
 0x132   : > { %472 = vst.msk [vmem:[#allocation2 + $0x38] sm:$0xff] %vm464_vm3, %v463_v10 }
 0x133   : > { %v481_v11 = vld [vmem:[#allocation2 + $0x20] sm:$0xff]  ;;  %v873_v13 = vmov 0   ;;  %v483_v16 = vld [vmem:[#allocation2 + $0x30] sm:$0xff]  ;;  %v482_v18 = vld [vmem:[#allocation2 + $0x28] sm:$0xff]  ;;  %vm521_vm4 = vcmask 64512   ;;  %vm537_vm5 = vcmask 57344  }
 0x134   : > { %v477_v12 = vld [vmem:[#allocation2] sm:$0xff]  ;;  %821 = vset.pattern.permute.xlu1 %v873_v13  ;;  %820 = vset.pattern.permute.xlu0 %v873_v13  ;;  %v489_v14 = vmul.f32 0.00390625, %v481_v11  ;;  %v491_v17 = vmul.f32 0.00390625, %v483_v16  ;;  %v478_v19 = vld [vmem:[#allocation2 + $0x8] sm:$0xff]  ;;  %v479_v20 = vld [vmem:[#allocation2 + $0x10] sm:$0xff]  ;;  %v490_v21 = vmul.f32 0.00390625, %v482_v18 }
 0x135   : > { %v485_v15 = vmul.f32 0.00390625, %v477_v12  ;;  %822 = vset.pattern.permute.xlu2 %v873_v13  ;;  %v486_v22 = vmul.f32 0.00390625, %v478_v19  ;;  %v487_v23 = vmul.f32 0.00390625, %v479_v20  ;;  %v480_v25 = vld [vmem:[#allocation2 + $0x18] sm:$0xff]  ;;  %v764_v31 = vld [vmem:[%s1097_s3 + $0x20] sm:$0xff]  ;;  %v765_v33 = vld [vmem:[%s1097_s3 + $0x28] sm:$0xff] }
 0x136   : > { %569 = vperm.xlu0 %820, %v489_v14   ;;  %579 = vperm.xlu2 %822, %v491_v17   ;;  %v488_v27 = vmul.f32 0.00390625, %v480_v25  ;;  %v493_v32 = vld [vmem:[%s1097_s3] sm:$0xff]  ;;  %v494_v34 = vld [vmem:[%s1097_s3 + $0x8] sm:$0xff]  ;;  %v766_v41 = vld [vmem:[%s1097_s3 + $0x30] sm:$0xff]  ;;  %vm634_vm6 = vcmask 1040384   ;;  %vm636_vm7 = vcmask 58368  }
 0x137   : > { %499 = vperm.xlu1 %821, %v485_v15   ;;  %v495_v42 = vld [vmem:[%s1097_s3 + $0x10] sm:$0xff]  ;;  %v767_v52 = vld [vmem:[%s1097_s3 + $0x38] sm:$0xff]  ;;  %v768_v12 = vld [vmem:[%s1098_s4 + $0x1] sm:$0x1] }
 0x138   : > { %v496_v53 = vld [vmem:[%s1097_s3 + $0x18] sm:$0xff]  ;;  %v535_v13 = vld [vmem:[%s1098_s4] sm:$0x1] }
 0x139   : > { %v484_v24 = vld [vmem:[#allocation2 + $0x38] sm:$0xff] }
 0x13a   : > { %v492_v26 = vmul.f32 0.00390625, %v484_v24 }
 0x13e   : > { %574 = vperm.xlu0 %820, %v490_v21   ;;  %509 = vperm.xlu2 %822, %v487_v23  }
 0x13f   : > { %504 = vperm.xlu1 %821, %v486_v22  }
 0x146   : > { %584 = vperm.xlu0 %820, %v492_v26  }
 0x147   : > { %514 = vperm.xlu1 %821, %v488_v27  }
 0x190   : > { %v580_v28 = vpop.permute.xlu2 %579 }
 0x191   : > { %v589_v46 = vmul.f32 %v766_v41, %v580_v28 }
 0x193   : > { %v594_v56 = vsel %vm521_vm4, %v589_v46, 0.0 }
 0x198   : > { %v510_v43 = vpop.permute.xlu2 %509 }
 0x199   : > { %v519_v49 = vmul.f32 %v510_v43, %v495_v42 }
 0x19b   : > { %v525_v57 = vsel %vm521_vm4, %v519_v49, 0.0 }
 0x1a8   : > { %v570_v29 = vpop.permute.xlu0 %569 }
 0x1a9   : > { %v500_v30 = vpop.permute.xlu1 %499  ;;  %v587_v37 = vmul.f32 %v764_v31, %v570_v29 }
 0x1aa   : > { %v517_v38 = vmul.f32 %v500_v30, %v493_v32 }
 0x1ab   : > { %v591_v47 = vsel %vm521_vm4, %v587_v37, 0.0 }
 0x1ac   : > { %v522_v48 = vsel %vm521_vm4, %v517_v38, 0.0 }
 0x1b0   : > { %v575_v35 = vpop.permute.xlu0 %574 }
 0x1b1   : > { %v505_v36 = vpop.permute.xlu1 %504  ;;  %v588_v39 = vmul.f32 %v765_v33, %v575_v35 }
 0x1b2   : > { %v518_v40 = vmul.f32 %v505_v36, %v494_v34 }
 0x1b3   : > { %v592_v44 = vsel %vm521_vm4, %v588_v39, 0.0 }
 0x1b4   : > { %v523_v45 = vsel %vm521_vm4, %v518_v40, 0.0  ;;  %v593_v50 = vadd.f32 %v592_v44, %v591_v47 }
 0x1b5   : > { %v524_v51 = vadd.f32 %v523_v45, %v522_v48 }
 0x1b6   : > { %v595_v60 = vadd.f32 %v594_v56, %v593_v50 }
 0x1b7   : > { %v526_v61 = vadd.f32 %v525_v57, %v524_v51 }
 0x1b8   : > { %v585_v54 = vpop.permute.xlu0 %584 }
 0x1b9   : > { %v515_v55 = vpop.permute.xlu1 %514  ;;  %v590_v58 = vmul.f32 %v767_v52, %v585_v54 }
 0x1ba   : > { %v520_v59 = vmul.f32 %v515_v55, %v496_v53 }
 0x1bb   : > { %v596_v62 = vsel %vm521_vm4, %v590_v58, 0.0 }
 0x1bc   : > { %v527_v63 = vsel %vm521_vm4, %v520_v59, 0.0  ;;  %v597_v0 = vadd.f32 %v596_v62, %v595_v60 }
 0x1bd   : > { %v528_v1 = vadd.f32 %v527_v63, %v526_v61 }
 0x1be   : > { %v598_v2 = vrot.slane %v597_v0, 4 }
 0x1bf   : > { %v529_v3 = vrot.slane %v528_v1, 4 }
 0x1c0   : > { %v599_v4 = vadd.f32 %v598_v2, %v597_v0 }
 0x1c1   : > { %v530_v5 = vadd.f32 %v529_v3, %v528_v1 }
 0x1c2   : > { %v600_v6 = vrot.slane %v599_v4, 2 }
 0x1c3   : > { %v531_v7 = vrot.slane %v530_v5, 2 }
 0x1c4   : > { %v601_v8 = vadd.f32 %v600_v6, %v599_v4 }
 0x1c5   : > { %v532_v9 = vadd.f32 %v531_v7, %v530_v5 }
 0x1c6   : > { %v602_v10 = vrot.slane %v601_v8, 1 }
 0x1c7   : > { %v533_v11 = vrot.slane %v532_v9, 1 }
 0x1c8   : > { %v603_v14 = vadd.f32 %v602_v10, %v601_v8 }
 0x1c9   : > { %v534_v15 = vadd.f32 %v533_v11, %v532_v9 }
 0x1ca   : > { %v606_v16 = vadd.f32 %v768_v12, %v603_v14 }
 0x1cb   : > { %v536_v17 = vadd.f32 %v535_v13, %v534_v15 }
 0x1cc   : > { %v607_v18 = vsel %vm537_vm5, %v606_v16, -inf  ;;  %v632_v19 = vrot.slane %v606_v16, 7 }
 0x1cd   : > { %v538_v20 = vsel %vm537_vm5, %v536_v17, -inf  ;;  %608 = vmax.xlane.f32.xlu2 %v607_v18 }
 0x1ce   : > { %539 = vmax.xlane.f32.xlu0 %v538_v20  ;;  %v635_v21 = vsel %vm634_vm6, %v536_v17, %v632_v19 }
 0x1cf   : > { %637 = vst.msk [vmem:[%s279_s9] sm:$0x3] %vm636_vm7, %v635_v21 }
 0x240   : > { %v609_v22 = vpop.xlane.xlu2 %608 }
 0x241   : > { %v540_v23 = vpop.xlane.xlu0 %539  ;;  %v610_v24 = vsub.f32 %v606_v16, %v609_v22 }
 0x242   : > { %v541_v25 = vsub.f32 %v536_v17, %v540_v23 }
 0x243   : > { %v611_v26 = vmul.f32 1.442695, %v610_v24 }
 0x244   : > { %v542_v27 = vmul.f32 1.442695, %v541_v25 }
 0x245   : > { %823 = vpow2.f32 %v611_v26 }
 0x246   : > { %825 = vpow2.f32 %v542_v27 }
 0x24b   : > { %v824_v28 = vpop.eup %823 }
 0x24c   : > { %v826_v29 = vpop.eup %825  ;;  %v613_v30 = vsel %vm537_vm5, %v824_v28, 0.0 }
 0x24d   : > { %614 = vadd.xlane.f32.xlu1 %v613_v30  ;;  %v544_v31 = vsel %vm537_vm5, %v826_v29, 0.0 }
 0x24e   : > { %545 = vadd.xlane.f32.xlu2 %v544_v31 }
 0x2c0   : > { %v615_v32 = vpop.xlane.xlu1 %614 }
 0x2c1   : > { %v546_v33 = vpop.xlane.xlu2 %545  ;;  %827 = vrcp.f32 %v615_v32  ;;  %v627_v40 = vand.u32 2147483648, %v615_v32  ;;  %v625_v43 = vand.u32 2147483647, %v615_v32  ;;  %vm621_vm10 = vweird.f32 %v615_v32 }
 0x2c2   : > { %829 = vrcp.f32 %v546_v33  ;;  %v558_v41 = vand.u32 2147483648, %v546_v33  ;;  %v556_v45 = vand.u32 2147483647, %v546_v33  ;;  %vm552_vm11 = vweird.f32 %v546_v33 }
 0x2c3   : > { %v628_v48 = vor.u32 1.1754944e-38, %v627_v40  ;;  %vm626_vm14 = vcmp.eq.f32.partialorder %v625_v43, 8.507059e+37 }
 0x2c4   : > { %v559_v49 = vor.u32 1.1754944e-38, %v558_v41  ;;  %vm557_vm15 = vcmp.eq.f32.partialorder %v556_v45, 8.507059e+37 }
 0x2c7   : > { %v828_v34 = vpop.eup %827 }
 0x2c8   : > { %v830_v35 = vpop.eup %829  ;;  %v617_v36 = vmul.f32 %v828_v34, %v615_v32  ;;  %vm622_vm8 = vweird.f32 %v828_v34 }
 0x2c9   : > { %v548_v37 = vmul.f32 %v830_v35, %v546_v33  ;;  %vm553_vm9 = vweird.f32 %v830_v35  ;;  %vm623_vm12 = vmor %vm621_vm10, %vm622_vm8 }
 0x2ca   : > { %v618_v38 = vsub.f32 1.0, %v617_v36  ;;  %vm554_vm13 = vmor %vm552_vm11, %vm553_vm9 }
 0x2cb   : > { %v549_v39 = vsub.f32 1.0, %v548_v37 }
 0x2cc   : > { %v619_v42 = vmul.f32 %v828_v34, %v618_v38 }
 0x2cd   : > { %v550_v44 = vmul.f32 %v830_v35, %v549_v39 }
 0x2ce   : > { %v620_v46 = vadd.f32 %v828_v34, %v619_v42 }
 0x2cf   : > { %v551_v47 = vadd.f32 %v830_v35, %v550_v44 }
 0x2d0   : > { %v624_v50 = vsel %vm623_vm12, %v828_v34, %v620_v46 }
 0x2d1   : > { %v555_v51 = vsel %vm554_vm13, %v830_v35, %v551_v47  ;;  %v629_v52 = vsel %vm626_vm14, %v628_v48, %v624_v50 }
 0x2d2   : > { %v560_v53 = vsel %vm557_vm15, %v559_v49, %v555_v51  ;;  %v630_v54 = vmul.f32 %v824_v28, %v629_v52 }
 0x2d3   : > { %v561_v55 = vmul.f32 %v826_v29, %v560_v53 }
 0x2d4   : > { %v639_v56 = vrot.slane %v630_v54, 7 }
 0x2d6   : > { %v641_v57 = vsel %vm634_vm6, %v561_v55, %v639_v56 }
 0x2d7   : > { %642 = vst.msk [vmem:[%s283_s13] sm:$0x3] %vm636_vm7, %v641_v57 }
 0x2d8 PF: > { %s17_s25 = sadd.s32 1, %s869_s25   ;;  %s1101_s21 = smov %s861_s23 }
 0x2d9   : > { %p14_p9 = scmp.ge.s32.totalorder %s17_s25, 6   ;;  %s1102_s22 = smov %s865_s24 }
 0x2da   : > { %s1103_s23 = smov %s1106_s26  ;;  %s1104_s24 = smov %s1110_s27 }
 0x2db   :  { %16 = sbr.rel (!%p14_p9) target bundleno = 3 (0x3), region = 92 }

</bundles_post_ra>
